<compile_context>
chip_gen: v5e
topology: v5e:2x2
jax: 0.10.0
libtpu: 0.0.40
codegen_flags: <defaults>
</compile_context>

<pallas_src>
import jax
import jax.numpy as jnp
from jax.experimental import pallas as pl
from jax.experimental.pallas import tpu as pltpu

LANE = 128
TB_ALIGN = 16                 # bf16 sublane packing -> row tiles multiple of 16
TB_CAP = 512                  # max rows per grid step
SPLIT_BATCH_THRESHOLD = 256   # above this, force >=2 grid steps (v7x megacore)


def _round_up(x, m):
    return ((x + m - 1) // m) * m


def _cdiv(a, b):
    return -(-a // b)


def _vmem_caps():
    """Generation-aware (budget, scoped-limit cap) in bytes."""
    try:
        phys = pltpu.get_tpu_info().vmem_capacity_bytes
    except Exception:
        phys = 64 * 1024 * 1024     # conservative v7x-sized fallback
    return int(phys * 0.70), int(phys * 0.85)


# ----------------------------------------------------------------------------
# Kernel: one batch tile of the fused 3-layer MLP (relu, relu, tanh).
# ----------------------------------------------------------------------------
def actor_kernel(x_ref, w1_ref, b1_ref, w2_ref, b2_ref, w3_ref, b3_ref, o_ref):
    wdt = w1_ref.dtype  # bf16 weights; f32 MXU accumulation; f32 VPU/EUP elementwise

    # fc1 + relu  (x already streamed in the weight dtype)
    h = jnp.dot(x_ref[...], w1_ref[...], preferred_element_type=jnp.float32)
    h = jnp.maximum(h + b1_ref[...], 0.0)

    # fc2 + relu
    h = jnp.dot(h.astype(wdt), w2_ref[...], preferred_element_type=jnp.float32)
    h = jnp.maximum(h + b2_ref[...], 0.0)

    # fc3 + tanh
    h = jnp.dot(h.astype(wdt), w3_ref[...], preferred_element_type=jnp.float32)
    o_ref[...] = jnp.tanh(h + b3_ref[...]).astype(o_ref.dtype)


# ----------------------------------------------------------------------------
# Param prep (done once): pad OUTPUT feature dims to lane multiples, cast to
# bf16.  The reduction dim of w1 (state_dim) stays unpadded on purpose.
# ----------------------------------------------------------------------------
def prepare_actor_params(params, weight_dtype=jnp.bfloat16):
    w1, b1, w2, b2, w3, b3 = (params["w1"], params["b1"], params["w2"],
                              params["b2"], params["w3"], params["b3"])
    S, H = w1.shape
    A = w3.shape[1]
    Hp, Ap = _round_up(H, LANE), _round_up(A, LANE)

    def pad2(a, r, c):
        return jnp.pad(a, ((0, r - a.shape[0]), (0, c - a.shape[1])))

    return {
        "w1": pad2(w1, S, Hp).astype(weight_dtype),     # K (=S) left unpadded
        "b1": pad2(b1, 1, Hp).astype(jnp.float32),
        "w2": pad2(w2, Hp, Hp).astype(weight_dtype),
        "b2": pad2(b2, 1, Hp).astype(jnp.float32),
        "w3": pad2(w3, Hp, Ap).astype(weight_dtype),
        "b3": pad2(b3, 1, Ap).astype(jnp.float32),
    }


def _vmem_bytes(tb, S, Hp, Ap, wbytes, bbytes, weight_buffers, x_itemsize):
    io = 2 * (tb * S * x_itemsize + tb * Ap * 4)   # double-buffered x / out tiles
    tmp = 2 * tb * Hp * 4                          # f32 hidden intermediates (+slack)
    return weight_buffers * (wbytes + bbytes) + io + tmp


# ----------------------------------------------------------------------------
# Wrapper: batch-tiled pallas_call with resident, single-buffered weights.
# ----------------------------------------------------------------------------
def actor_forward(state, prepared, action_dim):
    """state: [B, state_dim]; prepared: output of prepare_actor_params."""
    B, S = state.shape
    S_w, Hp = prepared["w1"].shape
    assert S_w == S, "state_dim mismatch with prepared params"
    Ap = prepared["w3"].shape[1]
    wdt = prepared["w1"].dtype
    x_itemsize = jnp.dtype(wdt).itemsize

    wbytes = (S * Hp + Hp * Hp + Hp * Ap) * x_itemsize
    bbytes = (2 * Hp + Ap) * 4
    budget, limit_cap = _vmem_caps()

    # Largest row tile (multiple of 16, <= TB_CAP) that fits the VMEM budget
    # with single-buffered weights.
    tb = min(TB_CAP, _round_up(B, TB_ALIGN))
    while tb > TB_ALIGN and _vmem_bytes(tb, S, Hp, Ap, wbytes, bbytes, 1,
                                        x_itemsize) > budget:
        tb = _round_up(tb // 2, TB_ALIGN)
    # TODO(synk): add a K-tiling fallback (grid axis over Hp + f32 accumulator
    # with pl.when init/finalize) for hidden_dim so large that even
    # single-buffered weights exceed the VMEM cap.

    # Balance tiles (avoid batch-padding waste) and keep >=2 grid steps for
    # larger batches so v7x's two TensorCores both get work.
    n_tiles = _cdiv(B, tb)
    if n_tiles == 1 and B >= SPLIT_BATCH_THRESHOLD:
        n_tiles = 2
    tb = _round_up(_cdiv(B, n_tiles), TB_ALIGN)
    Bp = n_tiles * tb

    # Stream the input at MXU precision; only the batch dim is padded.
    x = state.astype(wdt)
    if Bp != B:
        x = jnp.pad(x, ((0, Bp - B), (0, 0)))

    grid = (n_tiles,)
    row_map = lambda i: (i, 0)   # batch-tiled state / output
    res_map = lambda i: (0, 0)   # weights & biases: same block every step

    def build_call(single_buffer_weights):
        if single_buffer_weights:
            res = lambda shp: pl.BlockSpec(shp, res_map,
                                           pipeline_mode=pl.Buffered(1))
        else:
            res = lambda shp: pl.BlockSpec(shp, res_map)

        in_specs = [
            pl.BlockSpec((tb, S), row_map),   # full (unpadded) feature dim
            res((S, Hp)), res((1, Hp)),
            res((Hp, Hp)), res((1, Hp)),
            res((Hp, Ap)), res((1, Ap)),
        ]
        out_specs = pl.BlockSpec((tb, Ap), row_map)

        weight_buffers = 1 if single_buffer_weights else 2
        vmem_limit = min(
            int(_vmem_bytes(tb, S, Hp, Ap, wbytes, bbytes, weight_buffers,
                            x_itemsize) * 1.25) + (2 << 20),
            limit_cap,
        )
        cost = pl.CostEstimate(
            flops=2 * Bp * (S * Hp + Hp * Hp + Hp * Ap),
            transcendentals=Bp * Ap,
            bytes_accessed=Bp * S * x_itemsize + wbytes + bbytes + Bp * Ap * 4,
        )
        return pl.pallas_call(
            actor_kernel,
            out_shape=jax.ShapeDtypeStruct((Bp, Ap), jnp.float32),
            grid=grid,
            in_specs=in_specs,
            out_specs=out_specs,
            compiler_params=pltpu.CompilerParams(
                dimension_semantics=("parallel",),
                vmem_limit_bytes=vmem_limit,
            ),
            cost_estimate=cost,
        )

    args = (x, prepared["w1"], prepared["b1"], prepared["w2"], prepared["b2"],
            prepared["w3"], prepared["b3"])
    try:
        out = build_call(True)(*args)
    except Exception:
        # pipeline_mode=pl.Buffered(1) not supported on this jax version:
        # fall back to default double-buffered resident weights (correct,
        # slightly more VMEM).
        out = build_call(False)(*args)

    return out[:B, :action_dim]


# ----------------------------------------------------------------------------
# Init + pure-JAX reference (matches the PyTorch forward in f32).
# ----------------------------------------------------------------------------
def init_actor_params(key, state_dim, action_dim, hidden_dim):
    """Deterministic init mimicking nn.Linear default (uniform +-1/sqrt(fan_in))."""
    ks = jax.random.split(key, 6)

    def linear(kw, kb, fan_in, fan_out):
        bound = 1.0 / jnp.sqrt(fan_in)
        w = jax.random.uniform(kw, (fan_in, fan_out), jnp.float32, -bound, bound)
        b = jax.random.uniform(kb, (1, fan_out), jnp.float32, -bound, bound)
        return w, b

    w1, b1 = linear(ks[0], ks[1], state_dim, hidden_dim)
    w2, b2 = linear(ks[2], ks[3], hidden_dim, hidden_dim)
    w3, b3 = linear(ks[4], ks[5], hidden_dim, action_dim)
    return {"w1": w1, "b1": b1, "w2": w2, "b2": b2, "w3": w3, "b3": b3}


def actor_reference(state, params):
    h = jnp.maximum(state @ params["w1"] + params["b1"], 0.0)
    h = jnp.maximum(h @ params["w2"] + params["b2"], 0.0)
    return jnp.tanh(h @ params["w3"] + params["b3"])


if __name__ == "__main__":
    B, state_dim, action_dim, hidden_dim = 32, 16, 8, 32

    key = jax.random.PRNGKey(0)
    k_params, k_state = jax.random.split(key)

    params = init_actor_params(k_params, state_dim, action_dim, hidden_dim)
    prepared = prepare_actor_params(params)          # pad + bf16 cast, done once
    state = jax.random.normal(k_state, (B, state_dim), jnp.float32)

    out = actor_forward(state, prepared, action_dim)
    out = jax.block_until_ready(out)

    ref = actor_reference(state, params)
    assert out.shape == (B, action_dim)
    # bf16 weights/activations at the MXU -> loosen tolerance vs. f32 reference.
    assert jnp.allclose(out, ref, atol=2e-2, rtol=2e-2), "mismatch vs reference"

    print("KERNEL_OK")
</pallas_src>

<mosaic_0001>
module attributes {stable_mosaic.version = 11 : i64} {
  func.func @actor_kernel(%arg0: i32, %arg1: memref<32x16xbf16, #tpu.memory_space<vmem>>, %arg2: memref<16x128xbf16, #tpu.memory_space<vmem>>, %arg3: memref<1x128xf32, #tpu.memory_space<vmem>>, %arg4: memref<128x128xbf16, #tpu.memory_space<vmem>>, %arg5: memref<1x128xf32, #tpu.memory_space<vmem>>, %arg6: memref<128x128xbf16, #tpu.memory_space<vmem>>, %arg7: memref<1x128xf32, #tpu.memory_space<vmem>>, %arg8: memref<32x128xf32, #tpu.memory_space<vmem>>) attributes {dimension_semantics = [#tpu.dimension_semantics<parallel>], iteration_bounds = array<i64: 1>, scalar_prefetch = 0 : i64, scratch_operands = 0 : i64, tpu.core_type = #tpu.core_type<tc>, window_params = [{transform_indices = @transform_0, window_bounds = array<i64: 32, 16>}, {pipeline_mode = #tpu.pipeline_mode<synchronous>, transform_indices = @transform_1, window_bounds = array<i64: 16, 128>}, {pipeline_mode = #tpu.pipeline_mode<synchronous>, transform_indices = @transform_2, window_bounds = array<i64: 1, 128>}, {pipeline_mode = #tpu.pipeline_mode<synchronous>, transform_indices = @transform_3, window_bounds = array<i64: 128, 128>}, {pipeline_mode = #tpu.pipeline_mode<synchronous>, transform_indices = @transform_4, window_bounds = array<i64: 1, 128>}, {pipeline_mode = #tpu.pipeline_mode<synchronous>, transform_indices = @transform_5, window_bounds = array<i64: 128, 128>}, {pipeline_mode = #tpu.pipeline_mode<synchronous>, transform_indices = @transform_6, window_bounds = array<i64: 1, 128>}, {transform_indices = @transform_7, window_bounds = array<i64: 32, 128>}]} {
    %c0 = arith.constant 0 : index
    %c0_0 = arith.constant 0 : index
    %0 = vector.load %arg1[%c0, %c0_0] : memref<32x16xbf16, #tpu.memory_space<vmem>>, vector<32x16xbf16>
    %c0_1 = arith.constant 0 : index
    %c0_2 = arith.constant 0 : index
    %1 = vector.load %arg2[%c0_1, %c0_2] : memref<16x128xbf16, #tpu.memory_space<vmem>>, vector<16x128xbf16>
    %cst = arith.constant dense<0.000000e+00> : vector<32x128xf32>
    %2 = tpu.matmul %0, %1, %cst {dimension_numbers = #tpu.dot_dimension_numbers<[1], [0], [0], [1], [0, 0, 1, 1], [], []>} : vector<32x16xbf16>, vector<16x128xbf16>, vector<32x128xf32> -> vector<32x128xf32>
    %c0_3 = arith.constant 0 : index
    %c0_4 = arith.constant 0 : index
    %3 = vector.load %arg3[%c0_3, %c0_4] : memref<1x128xf32, #tpu.memory_space<vmem>>, vector<1x128xf32>
    %4 = vector.broadcast %3 : vector<1x128xf32> to vector<32x128xf32>
    %5 = arith.addf %2, %4 : vector<32x128xf32>
    %cst_5 = arith.constant 0.000000e+00 : f32
    %6 = vector.broadcast %cst_5 : f32 to vector<32x128xf32>
    %7 = arith.maximumf %5, %6 : vector<32x128xf32>
    %8 = arith.truncf %7 : vector<32x128xf32> to vector<32x128xbf16>
    %c0_6 = arith.constant 0 : index
    %c0_7 = arith.constant 0 : index
    %9 = vector.load %arg4[%c0_6, %c0_7] : memref<128x128xbf16, #tpu.memory_space<vmem>>, vector<128x128xbf16>
    %cst_8 = arith.constant dense<0.000000e+00> : vector<32x128xf32>
    %10 = tpu.matmul %8, %9, %cst_8 {dimension_numbers = #tpu.dot_dimension_numbers<[1], [0], [0], [1], [0, 0, 1, 1], [], []>} : vector<32x128xbf16>, vector<128x128xbf16>, vector<32x128xf32> -> vector<32x128xf32>
    %c0_9 = arith.constant 0 : index
    %c0_10 = arith.constant 0 : index
    %11 = vector.load %arg5[%c0_9, %c0_10] : memref<1x128xf32, #tpu.memory_space<vmem>>, vector<1x128xf32>
    %12 = vector.broadcast %11 : vector<1x128xf32> to vector<32x128xf32>
    %13 = arith.addf %10, %12 : vector<32x128xf32>
    %cst_11 = arith.constant 0.000000e+00 : f32
    %14 = vector.broadcast %cst_11 : f32 to vector<32x128xf32>
    %15 = arith.maximumf %13, %14 : vector<32x128xf32>
    %16 = arith.truncf %15 : vector<32x128xf32> to vector<32x128xbf16>
    %c0_12 = arith.constant 0 : index
    %c0_13 = arith.constant 0 : index
    %17 = vector.load %arg6[%c0_12, %c0_13] : memref<128x128xbf16, #tpu.memory_space<vmem>>, vector<128x128xbf16>
    %cst_14 = arith.constant dense<0.000000e+00> : vector<32x128xf32>
    %18 = tpu.matmul %16, %17, %cst_14 {dimension_numbers = #tpu.dot_dimension_numbers<[1], [0], [0], [1], [0, 0, 1, 1], [], []>} : vector<32x128xbf16>, vector<128x128xbf16>, vector<32x128xf32> -> vector<32x128xf32>
    %c0_15 = arith.constant 0 : index
    %c0_16 = arith.constant 0 : index
    %19 = vector.load %arg7[%c0_15, %c0_16] : memref<1x128xf32, #tpu.memory_space<vmem>>, vector<1x128xf32>
    %20 = vector.broadcast %19 : vector<1x128xf32> to vector<32x128xf32>
    %21 = arith.addf %18, %20 : vector<32x128xf32>
    %22 = math.tanh %21 : vector<32x128xf32>
    %c0_17 = arith.constant 0 : index
    %c0_18 = arith.constant 0 : index
    %23 = vector.load %arg8[%c0_17, %c0_18] : memref<32x128xf32, #tpu.memory_space<vmem>>, vector<32x128xf32>
    tpu.vector_store %arg8[%c0_17, %c0_18], %22 {strides = array<i32>} : memref<32x128xf32, #tpu.memory_space<vmem>>, vector<32x128xf32>,
    return
  }
  func.func @transform_0(%arg0: i32) -> (i32, i32) {
    %c0_i32 = arith.constant 0 : i32
    %c0_i32_0 = arith.constant 0 : i32
    return %arg0, %c0_i32 : i32, i32
  }
  func.func @transform_1(%arg0: i32) -> (i32, i32) {
    %c0_i32 = arith.constant 0 : i32
    %c0_i32_0 = arith.constant 0 : i32
    %c0_i32_1 = arith.constant 0 : i32
    return %c0_i32, %c0_i32_0 : i32, i32
  }
  func.func @transform_2(%arg0: i32) -> (i32, i32) {
    %c0_i32 = arith.constant 0 : i32
    %c0_i32_0 = arith.constant 0 : i32
    %c0_i32_1 = arith.constant 0 : i32
    return %c0_i32, %c0_i32_0 : i32, i32
  }
  func.func @transform_3(%arg0: i32) -> (i32, i32) {
    %c0_i32 = arith.constant 0 : i32
    %c0_i32_0 = arith.constant 0 : i32
    %c0_i32_1 = arith.constant 0 : i32
    return %c0_i32, %c0_i32_0 : i32, i32
  }
  func.func @transform_4(%arg0: i32) -> (i32, i32) {
    %c0_i32 = arith.constant 0 : i32
    %c0_i32_0 = arith.constant 0 : i32
    %c0_i32_1 = arith.constant 0 : i32
    return %c0_i32, %c0_i32_0 : i32, i32
  }
  func.func @transform_5(%arg0: i32) -> (i32, i32) {
    %c0_i32 = arith.constant 0 : i32
    %c0_i32_0 = arith.constant 0 : i32
    %c0_i32_1 = arith.constant 0 : i32
    return %c0_i32, %c0_i32_0 : i32, i32
  }
  func.func @transform_6(%arg0: i32) -> (i32, i32) {
    %c0_i32 = arith.constant 0 : i32
    %c0_i32_0 = arith.constant 0 : i32
    %c0_i32_1 = arith.constant 0 : i32
    return %c0_i32, %c0_i32_0 : i32, i32
  }
  func.func @transform_7(%arg0: i32) -> (i32, i32) {
    %c0_i32 = arith.constant 0 : i32
    %c0_i32_0 = arith.constant 0 : i32
    return %arg0, %c0_i32 : i32, i32
  }
}

module attributes {stable_mosaic.version = 11 : i64} {
  func.func @actor_kernel(%arg0: i32, %arg1: memref<32x16xbf16, #tpu.memory_space<vmem>>, %arg2: memref<16x128xbf16, #tpu.memory_space<vmem>>, %arg3: memref<1x128xf32, #tpu.memory_space<vmem>>, %arg4: memref<128x128xbf16, #tpu.memory_space<vmem>>, %arg5: memref<1x128xf32, #tpu.memory_space<vmem>>, %arg6: memref<128x128xbf16, #tpu.memory_space<vmem>>, %arg7: memref<1x128xf32, #tpu.memory_space<vmem>>, %arg8: memref<32x128xf32, #tpu.memory_space<vmem>>) attributes {dimension_semantics = [#tpu.dimension_semantics<parallel>], iteration_bounds = array<i64: 1>, scalar_prefetch = 0 : i64, scratch_operands = 0 : i64, tpu.core_type = #tpu.core_type<tc>, window_params = [{transform_indices = @transform_0, window_bounds = array<i64: 32, 16>}, {pipeline_mode = #tpu.pipeline_mode<synchronous>, transform_indices = @transform_1, window_bounds = array<i64: 16, 128>}, {pipeline_mode = #tpu.pipeline_mode<synchronous>, transform_indices = @transform_2, window_bounds = array<i64: 1, 128>}, {pipeline_mode = #tpu.pipeline_mode<synchronous>, transform_indices = @transform_3, window_bounds = array<i64: 128, 128>}, {pipeline_mode = #tpu.pipeline_mode<synchronous>, transform_indices = @transform_4, window_bounds = array<i64: 1, 128>}, {pipeline_mode = #tpu.pipeline_mode<synchronous>, transform_indices = @transform_5, window_bounds = array<i64: 128, 128>}, {pipeline_mode = #tpu.pipeline_mode<synchronous>, transform_indices = @transform_6, window_bounds = array<i64: 1, 128>}, {transform_indices = @transform_7, window_bounds = array<i64: 32, 128>}]} {
    %c0 = arith.constant 0 : index
    %c0_0 = arith.constant 0 : index
    %0 = vector.load %arg1[%c0, %c0_0] : memref<32x16xbf16, #tpu.memory_space<vmem>>, vector<32x16xbf16>
    %c0_1 = arith.constant 0 : index
    %c0_2 = arith.constant 0 : index
    %1 = vector.load %arg2[%c0_1, %c0_2] : memref<16x128xbf16, #tpu.memory_space<vmem>>, vector<16x128xbf16>
    %cst = arith.constant dense<0.000000e+00> : vector<32x128xf32>
    %2 = tpu.matmul %0, %1, %cst {dimension_numbers = #tpu.dot_dimension_numbers<[1], [0], [0], [1], [0, 0, 1, 1], [], []>} : vector<32x16xbf16>, vector<16x128xbf16>, vector<32x128xf32> -> vector<32x128xf32>
    %c0_3 = arith.constant 0 : index
    %c0_4 = arith.constant 0 : index
    %3 = vector.load %arg3[%c0_3, %c0_4] : memref<1x128xf32, #tpu.memory_space<vmem>>, vector<1x128xf32>
    %4 = vector.broadcast %3 : vector<1x128xf32> to vector<32x128xf32>
    %5 = arith.addf %2, %4 : vector<32x128xf32>
    %cst_5 = arith.constant 0.000000e+00 : f32
    %6 = vector.broadcast %cst_5 : f32 to vector<32x128xf32>
    %7 = arith.maximumf %5, %6 : vector<32x128xf32>
    %8 = arith.truncf %7 : vector<32x128xf32> to vector<32x128xbf16>
    %c0_6 = arith.constant 0 : index
    %c0_7 = arith.constant 0 : index
    %9 = vector.load %arg4[%c0_6, %c0_7] : memref<128x128xbf16, #tpu.memory_space<vmem>>, vector<128x128xbf16>
    %cst_8 = arith.constant dense<0.000000e+00> : vector<32x128xf32>
    %10 = tpu.matmul %8, %9, %cst_8 {dimension_numbers = #tpu.dot_dimension_numbers<[1], [0], [0], [1], [0, 0, 1, 1], [], []>} : vector<32x128xbf16>, vector<128x128xbf16>, vector<32x128xf32> -> vector<32x128xf32>
    %c0_9 = arith.constant 0 : index
    %c0_10 = arith.constant 0 : index
    %11 = vector.load %arg5[%c0_9, %c0_10] : memref<1x128xf32, #tpu.memory_space<vmem>>, vector<1x128xf32>
    %12 = vector.broadcast %11 : vector<1x128xf32> to vector<32x128xf32>
    %13 = arith.addf %10, %12 : vector<32x128xf32>
    %cst_11 = arith.constant 0.000000e+00 : f32
    %14 = vector.broadcast %cst_11 : f32 to vector<32x128xf32>
    %15 = arith.maximumf %13, %14 : vector<32x128xf32>
    %16 = arith.truncf %15 : vector<32x128xf32> to vector<32x128xbf16>
    %c0_12 = arith.constant 0 : index
    %c0_13 = arith.constant 0 : index
    %17 = vector.load %arg6[%c0_12, %c0_13] : memref<128x128xbf16, #tpu.memory_space<vmem>>, vector<128x128xbf16>
    %cst_14 = arith.constant dense<0.000000e+00> : vector<32x128xf32>
    %18 = tpu.matmul %16, %17, %cst_14 {dimension_numbers = #tpu.dot_dimension_numbers<[1], [0], [0], [1], [0, 0, 1, 1], [], []>} : vector<32x128xbf16>, vector<128x128xbf16>, vector<32x128xf32> -> vector<32x128xf32>
    %c0_15 = arith.constant 0 : index
    %c0_16 = arith.constant 0 : index
    %19 = vector.load %arg7[%c0_15, %c0_16] : memref<1x128xf32, #tpu.memory_space<vmem>>, vector<1x128xf32>
    %20 = vector.broadcast %19 : vector<1x128xf32> to vector<32x128xf32>
    %21 = arith.addf %18, %20 : vector<32x128xf32>
    %22 = math.tanh %21 : vector<32x128xf32>
    %c0_17 = arith.constant 0 : index
    %c0_18 = arith.constant 0 : index
    %23 = vector.load %arg8[%c0_17, %c0_18] : memref<32x128xf32, #tpu.memory_space<vmem>>, vector<32x128xf32>
    tpu.vector_store %arg8[%c0_17, %c0_18], %22 {strides = array<i32>} : memref<32x128xf32, #tpu.memory_space<vmem>>, vector<32x128xf32>,
    return
  }
  func.func @transform_0(%arg0: i32) -> (i32, i32) {
    %c0_i32 = arith.constant 0 : i32
    %c0_i32_0 = arith.constant 0 : i32
    return %arg0, %c0_i32 : i32, i32
  }
  func.func @transform_1(%arg0: i32) -> (i32, i32) {
    %c0_i32 = arith.constant 0 : i32
    %c0_i32_0 = arith.constant 0 : i32
    %c0_i32_1 = arith.constant 0 : i32
    return %c0_i32, %c0_i32_0 : i32, i32
  }
  func.func @transform_2(%arg0: i32) -> (i32, i32) {
    %c0_i32 = arith.constant 0 : i32
    %c0_i32_0 = arith.constant 0 : i32
    %c0_i32_1 = arith.constant 0 : i32
    return %c0_i32, %c0_i32_0 : i32, i32
  }
  func.func @transform_3(%arg0: i32) -> (i32, i32) {
    %c0_i32 = arith.constant 0 : i32
    %c0_i32_0 = arith.constant 0 : i32
    %c0_i32_1 = arith.constant 0 : i32
    return %c0_i32, %c0_i32_0 : i32, i32
  }
  func.func @transform_4(%arg0: i32) -> (i32, i32) {
    %c0_i32 = arith.constant 0 : i32
    %c0_i32_0 = arith.constant 0 : i32
    %c0_i32_1 = arith.constant 0 : i32
    return %c0_i32, %c0_i32_0 : i32, i32
  }
  func.func @transform_5(%arg0: i32) -> (i32, i32) {
    %c0_i32 = arith.constant 0 : i32
    %c0_i32_0 = arith.constant 0 : i32
    %c0_i32_1 = arith.constant 0 : i32
    return %c0_i32, %c0_i32_0 : i32, i32
  }
  func.func @transform_6(%arg0: i32) -> (i32, i32) {
    %c0_i32 = arith.constant 0 : i32
    %c0_i32_0 = arith.constant 0 : i32
    %c0_i32_1 = arith.constant 0 : i32
    return %c0_i32, %c0_i32_0 : i32, i32
  }
  func.func @transform_7(%arg0: i32) -> (i32, i32) {
    %c0_i32 = arith.constant 0 : i32
    %c0_i32_0 = arith.constant 0 : i32
    return %arg0, %c0_i32 : i32, i32
  }
}

</mosaic_0001>

<bundles_post_ra>
// kernel: tpu_custom_call.1
= control target key start
LH: loop header
LB: loop body
LE: loop exit
PB: predicated region body
PF: predicated region fallthrough
CT: control target
= control target key end

     0   :  { %12 = vsyncpa [#allocation3], 0  ;;  %s609_s0 = inlined_call_operand.vmem [shape: bf16[32,16], index: 0, kind: input, shape index: {}]   ;;  %s610_s1 = inlined_call_operand.vmem [shape: bf16[16,128], index: 1, kind: input, shape index: {}]   ;;  %s611_s2 = inlined_call_operand.vmem [shape: f32[1,128], index: 2, kind: input, shape index: {}]   ;;  %s612_s3 = inlined_call_operand.hbm [shape: bf16[128,128], index: 3, kind: input, shape index: {}]   ;;  %s613_s4 = inlined_call_operand.vmem [shape: f32[1,128], index: 4, kind: input, shape index: {}]   ;;  %s614_s5 = inlined_call_operand.hbm [shape: bf16[128,128], index: 5, kind: input, shape index: {}]   ;;  %s615_s6 = inlined_call_operand.vmem [shape: f32[1,128], index: 6, kind: input, shape index: {}]   ;;  %s616_s7 = inlined_call_operand.hbm [shape: f32[32,128], index: 7, kind: output, shape index: {}]  }
   0x1   :  { %13 = vsyncpa [#allocation6], 0 }
   0x2   :  { %14 = vsyncpa [#allocation4], 0  ;;  %s25_s26 = sshll.u32 %s612_s3, 4  ;;  %s535_s27 = smov [#allocation2]   ;;  %s26_s26 = int_to_ptr.hbm [resolvable:$true] %s25_s26 }
   0x3   :  { %s27_s28 = sshll.u32 %s535_s27, 4  ;;  %s40_s8 = sshll.u32 %s614_s5, 4  ;;  %s28_s28 = int_to_ptr.vmem [resolvable:$true] %s27_s28  ;;  %s41_s8 = int_to_ptr.hbm [resolvable:$true] %s40_s8 }
   0x4   :  { %s536_s9 = smov 64   ;;  %s537_s10 = smov 4  }
   0x5   :  { %33 = dma.hbm_to_vmem [thread:$0]  %s26_s26, 1024, %s28_s28, [#allocation3], %s536_s9, %s536_s9, %s537_s10  }
   0x6   :  { %s538_s11 = smov [#allocation5]  }
   0x7   :  { %s42_s12 = sshll.u32 %s538_s11, 4  ;;  %s43_s12 = int_to_ptr.vmem [resolvable:$true] %s42_s12 }
   0x8   :  { %48 = dma.hbm_to_vmem [thread:$0]  %s41_s8, 1024, %s43_s12, [#allocation6], %s536_s9, %s536_s9, %s537_s10  }
   0x9   :  { %529 = dma.done.wait [#allocation3], 1024  }
   0xa   :  { %530 = vsyncadd [#allocation3], 4294966272 }
   0xb   :  { %531 = dma.done.wait [#allocation6], 1024  }
   0xc   :  { %532 = vsyncadd [#allocation6], 4294966272  ;;  %v406_v0 = vld [vmem:[%s610_s1] sm:$0xff]  ;;  %v414_v2 = vld [vmem:[#allocation2 + $0x38] sm:$0xff]  ;;  %vm86_vm0 = vcmask 130048   ;;  %s312_s22 = sshll.u32 %s616_s7, 4  ;;  %s313_s22 = int_to_ptr.hbm [resolvable:$true] %s312_s22 }
   0xd   :  { %v404_v1 = vld [vmem:[%s609_s0] sm:$0xff]  ;;  %100 = vmatpush.bf16.msra.mxu0 %v406_v0  ;;  %186 = vmatpush.bf16.msra.mxu1 %v414_v2  ;;  %v413_v3 = vld [vmem:[#allocation2 + $0x30] sm:$0xff]  ;;  %v412_v4 = vld [vmem:[#allocation2 + $0x28] sm:$0xff]  ;;  %s540_s23 = smov 128   ;;  %s541_s24 = smov 8  }
   0xe   :  { %423 = vmatpush.bf16.msra.mxu3 %v414_v2  ;;  %v411_v5 = vld [vmem:[#allocation2 + $0x20] sm:$0xff]  ;;  %v405_v6 = vld [vmem:[%s609_s0 + $0x8] sm:$0xff]  ;;  %v410_v7 = vld [vmem:[#allocation2 + $0x18] sm:$0xff] }
   0xf   :  { %v409_v8 = vld [vmem:[#allocation2 + $0x10] sm:$0xff]  ;;  %v408_v9 = vld [vmem:[#allocation2 + $0x8] sm:$0xff]  ;;  %v407_v10 = vld [vmem:[#allocation2] sm:$0xff] }
  0x10   :  { %338 = vmatmul.msk.bf16.vlgmr.msra.gmra.mxu0 %vm86_vm0, %v404_v1  ;;  %v422_v11 = vld [vmem:[#allocation5 + $0x38] sm:$0xff]  ;;  %v421_v13 = vld [vmem:[#allocation5 + $0x30] sm:$0xff]  ;;  %v446_v14 = vld [vmem:[%s611_s2] ss:$0 sm:$0xff] }
  0x11   :  { %187 = vmatpush.bf16.msra.mxu1 %v413_v3  ;;  %279 = vmatpush.bf16.msrb.mxu0 %v422_v11  ;;  %v420_v15 = vld [vmem:[#allocation5 + $0x28] sm:$0xff]  ;;  %v419_v19 = vld [vmem:[#allocation5 + $0x20] sm:$0xff]  ;;  %v418_v30 = vld [vmem:[#allocation5 + $0x18] sm:$0xff] }
  0x12   :  { %424 = vmatpush.bf16.msra.mxu3 %v413_v3  ;;  %431 = vmatpush.bf16.msra.mxu2 %v422_v11  ;;  %v417_v31 = vld [vmem:[#allocation5 + $0x10] sm:$0xff]  ;;  %v416_v32 = vld [vmem:[#allocation5 + $0x8] sm:$0xff]  ;;  %v415_v33 = vld [vmem:[#allocation5] sm:$0xff] }
  0x13   :  { %v447_v35 = vld [vmem:[%s613_s4] ss:$0 sm:$0xff]  ;;  %s539_s4 = smov [#allocation7]  }
  0x14   :  { %v448_v49 = vld [vmem:[%s615_s6] ss:$0 sm:$0xff]  ;;  %s310_s6 = sshll.u32 %s539_s4, 4  ;;  %s311_s6 = int_to_ptr.vmem [resolvable:$true] %s310_s6 }
  0x15   :  { %188 = vmatpush.bf16.msra.mxu1 %v412_v4  ;;  %280 = vmatpush.bf16.msrb.mxu0 %v421_v13 }
  0x16   :  { %425 = vmatpush.bf16.msra.mxu3 %v412_v4  ;;  %432 = vmatpush.bf16.msra.mxu2 %v421_v13 }
  0x19   :  { %189 = vmatpush.bf16.msra.mxu1 %v411_v5  ;;  %281 = vmatpush.bf16.msrb.mxu0 %v420_v15 }
  0x1a   :  { %426 = vmatpush.bf16.msra.mxu3 %v411_v5  ;;  %433 = vmatpush.bf16.msra.mxu2 %v420_v15 }
  0x1d   :  { %190 = vmatpush.bf16.msra.mxu1 %v410_v7  ;;  %282 = vmatpush.bf16.msrb.mxu0 %v419_v19 }
  0x1e   :  { %427 = vmatpush.bf16.msra.mxu3 %v410_v7  ;;  %434 = vmatpush.bf16.msra.mxu2 %v419_v19 }
  0x20   :  { %339 = vmatmul.msk.bf16.gmra.mxu0 %vm86_vm0, %v405_v6 }
  0x21   :  { %191 = vmatpush.bf16.msra.mxu1 %v409_v8  ;;  %283 = vmatpush.bf16.msrb.mxu0 %v418_v30 }
  0x22   :  { %428 = vmatpush.bf16.msra.mxu3 %v409_v8  ;;  %435 = vmatpush.bf16.msra.mxu2 %v418_v30 }
  0x25   :  { %192 = vmatpush.bf16.msra.mxu1 %v408_v9  ;;  %284 = vmatpush.bf16.msrb.mxu0 %v417_v31 }
  0x26   :  { %429 = vmatpush.bf16.msra.mxu3 %v408_v9  ;;  %436 = vmatpush.bf16.msra.mxu2 %v417_v31 }
  0x29   :  { %193 = vmatpush.bf16.msra.mxu1 %v407_v10  ;;  %285 = vmatpush.bf16.msrb.mxu0 %v416_v32 }
  0x2a   :  { %430 = vmatpush.bf16.msra.mxu3 %v407_v10  ;;  %437 = vmatpush.bf16.msra.mxu2 %v416_v32 }
  0x2d   :  { %286 = vmatpush.bf16.msrb.mxu0 %v415_v33 }
  0x2e   :  { %438 = vmatpush.bf16.msra.mxu2 %v415_v33 }
  0x8d   :  { %v102_v12 = vpop.f32.mrf.mxu0 }
  0x8e   :  { %v103_v16 = vadd.f32 %v446_v14, %v102_v12 }
  0x90   :  { %v112_v20 = vmax.f32 %v103_v16, 0.0 }
  0x95   :  { %v104_v17 = vpop.f32.mrf.mxu0 }
  0x96   :  { %v105_v18 = vadd.f32 %v446_v14, %v104_v17 }
  0x98   :  { %v113_v21 = vmax.f32 %v105_v18, 0.0 }
  0x9a   :  { %v116_v22 = vpack.c.bf16 %v113_v21, %v112_v20 }
  0x9c   :  { %194 = vmatmul.bf16.vlgmr.msra.gmra.mxu1 %v116_v22 }
  0x9d   :  { %v107_v23 = vpop.f32.mrf.mxu0 }
  0x9e   :  { %v108_v24 = vadd.f32 %v446_v14, %v107_v23 }
  0xa0   :  { %v114_v27 = vmax.f32 %v108_v24, 0.0 }
  0xa5   :  { %v109_v25 = vpop.f32.mrf.mxu0 }
  0xa6   :  { %v110_v26 = vadd.f32 %v446_v14, %v109_v25 }
  0xa8   :  { %v115_v28 = vmax.f32 %v110_v26, 0.0 }
  0xaa   :  { %v117_v29 = vpack.c.bf16 %v115_v28, %v114_v27 }
  0xac   :  { %199 = vmatmul.bf16.vlgmr.msra.gmra.mxu3 %v117_v29 }
 0x119   :  { %v195_v34 = vpop.f32.mrf.mxu1 }
 0x11a   :  { %v196_v36 = vadd.f32 %v447_v35, %v195_v34 }
 0x11c   :  { %v205_v39 = vmax.f32 %v196_v36, 0.0 }
 0x121   :  { %v197_v37 = vpop.f32.mrf.mxu1 }
 0x122   :  { %v198_v38 = vadd.f32 %v447_v35, %v197_v37 }
 0x124   :  { %v206_v40 = vmax.f32 %v198_v38, 0.0 }
 0x126   :  { %v209_v41 = vpack.c.bf16 %v206_v40, %v205_v39 }
 0x128   :  { %287 = vmatmul.bf16.vlgmr.msrb.gmra.mxu0 %v209_v41 }
 0x12f   :  { %v200_v42 = vpop.f32.mrf.mxu3 }
 0x130   :  { %v201_v43 = vadd.f32 %v447_v35, %v200_v42 }
 0x132   :  { %v207_v46 = vmax.f32 %v201_v43, 0.0 }
 0x137   :  { %v202_v44 = vpop.f32.mrf.mxu3 }
 0x138   :  { %v203_v45 = vadd.f32 %v447_v35, %v202_v44 }
 0x13a   :  { %v208_v47 = vmax.f32 %v203_v45, 0.0 }
 0x13c   :  { %v210_v48 = vpack.c.bf16 %v208_v47, %v207_v46 }
 0x13e   :  { %292 = vmatmul.bf16.vlgmr.msra.gmra.mxu2 %v210_v48 }
 0x1a5   :  { %v288_v50 = vpop.f32.mrf.mxu0 }
 0x1a6   :  { %v289_v51 = vadd.f32 %v448_v49, %v288_v50 }
 0x1a8   :  { %449 = vtanh.f32 %v289_v51 }
 0x1ad   :  { %v290_v52 = vpop.f32.mrf.mxu0 }
 0x1ae   :  { %v450_v53 = vpop.eup %449  ;;  %v291_v54 = vadd.f32 %v448_v49, %v290_v52 }
 0x1af   :  { %302 = vst [vmem:[#allocation7] sm:$0xff] %v450_v53 }
 0x1b0   :  { %451 = vtanh.f32 %v291_v54 }
 0x1b6   :  { %v452_v55 = vpop.eup %451 }
 0x1b7   :  { %303 = vst [vmem:[#allocation7 + $0x8] sm:$0xff] %v452_v55 }
 0x1c1   :  { %v293_v56 = vpop.f32.mrf.mxu2 }
 0x1c2   :  { %v294_v57 = vadd.f32 %v448_v49, %v293_v56 }
 0x1c4   :  { %453 = vtanh.f32 %v294_v57 }
 0x1c9   :  { %v295_v58 = vpop.f32.mrf.mxu2 }
 0x1ca   :  { %v454_v59 = vpop.eup %453  ;;  %v296_v60 = vadd.f32 %v448_v49, %v295_v58 }
 0x1cb   :  { %304 = vst [vmem:[#allocation7 + $0x10] sm:$0xff] %v454_v59 }
 0x1cc   :  { %455 = vtanh.f32 %v296_v60 }
 0x1d2   :  { %v456_v61 = vpop.eup %455 }
 0x1d3   :  { %305 = vst [vmem:[#allocation7 + $0x18] sm:$0xff] %v456_v61 }
 0x1d4   :  { %318 = dma.vmem_to_hbm [thread:$0]  %s311_s6, 512, %s313_s22, [#allocation4], %s540_s23, %s540_s23, %s541_s24  }
 0x1d5   :  { %533 = dma.done.wait [#allocation4], 512  }
 0x1d6   :  { %534 = vsyncadd [#allocation4], 4294966784 }
 0x1d7   :  { %323 = vsyncpa [#allocation3], 1 }
 0x1d8   :  { %324 = vsyncpa [#allocation6], 1 }
 0x1d9   :  { %325 = vsyncpa [#allocation4], 1 }

// kernel: tpu_custom_call.1
= control target key start
LH: loop header
LB: loop body
LE: loop exit
PB: predicated region body
PF: predicated region fallthrough
CT: control target
= control target key end

     0   :  { %12 = vsyncpa [#allocation3], 0  ;;  %s609_s0 = inlined_call_operand.vmem [shape: bf16[32,16], index: 0, kind: input, shape index: {}]   ;;  %s610_s1 = inlined_call_operand.vmem [shape: bf16[16,128], index: 1, kind: input, shape index: {}]   ;;  %s611_s2 = inlined_call_operand.vmem [shape: f32[1,128], index: 2, kind: input, shape index: {}]   ;;  %s612_s3 = inlined_call_operand.hbm [shape: bf16[128,128], index: 3, kind: input, shape index: {}]   ;;  %s613_s4 = inlined_call_operand.vmem [shape: f32[1,128], index: 4, kind: input, shape index: {}]   ;;  %s614_s5 = inlined_call_operand.hbm [shape: bf16[128,128], index: 5, kind: input, shape index: {}]   ;;  %s615_s6 = inlined_call_operand.vmem [shape: f32[1,128], index: 6, kind: input, shape index: {}]   ;;  %s616_s7 = inlined_call_operand.hbm [shape: f32[32,128], index: 7, kind: output, shape index: {}]  }
   0x1   :  { %13 = vsyncpa [#allocation6], 0 }
   0x2   :  { %14 = vsyncpa [#allocation4], 0  ;;  %s25_s26 = sshll.u32 %s612_s3, 4  ;;  %s535_s27 = smov [#allocation2]   ;;  %s26_s26 = int_to_ptr.hbm [resolvable:$true] %s25_s26 }
   0x3   :  { %s27_s28 = sshll.u32 %s535_s27, 4  ;;  %s40_s8 = sshll.u32 %s614_s5, 4  ;;  %s28_s28 = int_to_ptr.vmem [resolvable:$true] %s27_s28  ;;  %s41_s8 = int_to_ptr.hbm [resolvable:$true] %s40_s8 }
   0x4   :  { %s536_s9 = smov 64   ;;  %s537_s10 = smov 4  }
   0x5   :  { %33 = dma.hbm_to_vmem [thread:$0]  %s26_s26, 1024, %s28_s28, [#allocation3], %s536_s9, %s536_s9, %s537_s10  }
   0x6   :  { %s538_s11 = smov [#allocation5]  }
   0x7   :  { %s42_s12 = sshll.u32 %s538_s11, 4  ;;  %s43_s12 = int_to_ptr.vmem [resolvable:$true] %s42_s12 }
   0x8   :  { %48 = dma.hbm_to_vmem [thread:$0]  %s41_s8, 1024, %s43_s12, [#allocation6], %s536_s9, %s536_s9, %s537_s10  }
   0x9   :  { %529 = dma.done.wait [#allocation3], 1024  }
   0xa   :  { %530 = vsyncadd [#allocation3], 4294966272 }
   0xb   :  { %531 = dma.done.wait [#allocation6], 1024  }
   0xc   :  { %532 = vsyncadd [#allocation6], 4294966272  ;;  %v406_v0 = vld [vmem:[%s610_s1] sm:$0xff]  ;;  %v414_v2 = vld [vmem:[#allocation2 + $0x38] sm:$0xff]  ;;  %vm86_vm0 = vcmask 130048   ;;  %s312_s22 = sshll.u32 %s616_s7, 4  ;;  %s313_s22 = int_to_ptr.hbm [resolvable:$true] %s312_s22 }
   0xd   :  { %v404_v1 = vld [vmem:[%s609_s0] sm:$0xff]  ;;  %100 = vmatpush.bf16.msra.mxu0 %v406_v0  ;;  %186 = vmatpush.bf16.msra.mxu1 %v414_v2  ;;  %v413_v3 = vld [vmem:[#allocation2 + $0x30] sm:$0xff]  ;;  %v412_v4 = vld [vmem:[#allocation2 + $0x28] sm:$0xff]  ;;  %s540_s23 = smov 128   ;;  %s541_s24 = smov 8  }
   0xe   :  { %423 = vmatpush.bf16.msra.mxu3 %v414_v2  ;;  %v411_v5 = vld [vmem:[#allocation2 + $0x20] sm:$0xff]  ;;  %v405_v6 = vld [vmem:[%s609_s0 + $0x8] sm:$0xff]  ;;  %v410_v7 = vld [vmem:[#allocation2 + $0x18] sm:$0xff] }
   0xf   :  { %v409_v8 = vld [vmem:[#allocation2 + $0x10] sm:$0xff]  ;;  %v408_v9 = vld [vmem:[#allocation2 + $0x8] sm:$0xff]  ;;  %v407_v10 = vld [vmem:[#allocation2] sm:$0xff] }
  0x10   :  { %338 = vmatmul.msk.bf16.vlgmr.msra.gmra.mxu0 %vm86_vm0, %v404_v1  ;;  %v422_v11 = vld [vmem:[#allocation5 + $0x38] sm:$0xff]  ;;  %v421_v13 = vld [vmem:[#allocation5 + $0x30] sm:$0xff]  ;;  %v446_v14 = vld [vmem:[%s611_s2] ss:$0 sm:$0xff] }
  0x11   :  { %187 = vmatpush.bf16.msra.mxu1 %v413_v3  ;;  %279 = vmatpush.bf16.msrb.mxu0 %v422_v11  ;;  %v420_v15 = vld [vmem:[#allocation5 + $0x28] sm:$0xff]  ;;  %v419_v19 = vld [vmem:[#allocation5 + $0x20] sm:$0xff]  ;;  %v418_v30 = vld [vmem:[#allocation5 + $0x18] sm:$0xff] }
  0x12   :  { %424 = vmatpush.bf16.msra.mxu3 %v413_v3  ;;  %431 = vmatpush.bf16.msra.mxu2 %v422_v11  ;;  %v417_v31 = vld [vmem:[#allocation5 + $0x10] sm:$0xff]  ;;  %v416_v32 = vld [vmem:[#allocation5 + $0x8] sm:$0xff]  ;;  %v415_v33 = vld [vmem:[#allocation5] sm:$0xff] }
  0x13   :  { %v447_v35 = vld [vmem:[%s613_s4] ss:$0 sm:$0xff]  ;;  %s539_s4 = smov [#allocation7]  }
  0x14   :  { %v448_v49 = vld [vmem:[%s615_s6] ss:$0 sm:$0xff]  ;;  %s310_s6 = sshll.u32 %s539_s4, 4  ;;  %s311_s6 = int_to_ptr.vmem [resolvable:$true] %s310_s6 }
  0x15   :  { %188 = vmatpush.bf16.msra.mxu1 %v412_v4  ;;  %280 = vmatpush.bf16.msrb.mxu0 %v421_v13 }
  0x16   :  { %425 = vmatpush.bf16.msra.mxu3 %v412_v4  ;;  %432 = vmatpush.bf16.msra.mxu2 %v421_v13 }
  0x19   :  { %189 = vmatpush.bf16.msra.mxu1 %v411_v5  ;;  %281 = vmatpush.bf16.msrb.mxu0 %v420_v15 }
  0x1a   :  { %426 = vmatpush.bf16.msra.mxu3 %v411_v5  ;;  %433 = vmatpush.bf16.msra.mxu2 %v420_v15 }
  0x1d   :  { %190 = vmatpush.bf16.msra.mxu1 %v410_v7  ;;  %282 = vmatpush.bf16.msrb.mxu0 %v419_v19 }
  0x1e   :  { %427 = vmatpush.bf16.msra.mxu3 %v410_v7  ;;  %434 = vmatpush.bf16.msra.mxu2 %v419_v19 }
  0x20   :  { %339 = vmatmul.msk.bf16.gmra.mxu0 %vm86_vm0, %v405_v6 }
  0x21   :  { %191 = vmatpush.bf16.msra.mxu1 %v409_v8  ;;  %283 = vmatpush.bf16.msrb.mxu0 %v418_v30 }
  0x22   :  { %428 = vmatpush.bf16.msra.mxu3 %v409_v8  ;;  %435 = vmatpush.bf16.msra.mxu2 %v418_v30 }
  0x25   :  { %192 = vmatpush.bf16.msra.mxu1 %v408_v9  ;;  %284 = vmatpush.bf16.msrb.mxu0 %v417_v31 }
  0x26   :  { %429 = vmatpush.bf16.msra.mxu3 %v408_v9  ;;  %436 = vmatpush.bf16.msra.mxu2 %v417_v31 }
  0x29   :  { %193 = vmatpush.bf16.msra.mxu1 %v407_v10  ;;  %285 = vmatpush.bf16.msrb.mxu0 %v416_v32 }
  0x2a   :  { %430 = vmatpush.bf16.msra.mxu3 %v407_v10  ;;  %437 = vmatpush.bf16.msra.mxu2 %v416_v32 }
  0x2d   :  { %286 = vmatpush.bf16.msrb.mxu0 %v415_v33 }
  0x2e   :  { %438 = vmatpush.bf16.msra.mxu2 %v415_v33 }
  0x8d   :  { %v102_v12 = vpop.f32.mrf.mxu0 }
  0x8e   :  { %v103_v16 = vadd.f32 %v446_v14, %v102_v12 }
  0x90   :  { %v112_v20 = vmax.f32 %v103_v16, 0.0 }
  0x95   :  { %v104_v17 = vpop.f32.mrf.mxu0 }
  0x96   :  { %v105_v18 = vadd.f32 %v446_v14, %v104_v17 }
  0x98   :  { %v113_v21 = vmax.f32 %v105_v18, 0.0 }
  0x9a   :  { %v116_v22 = vpack.c.bf16 %v113_v21, %v112_v20 }
  0x9c   :  { %194 = vmatmul.bf16.vlgmr.msra.gmra.mxu1 %v116_v22 }
  0x9d   :  { %v107_v23 = vpop.f32.mrf.mxu0 }
  0x9e   :  { %v108_v24 = vadd.f32 %v446_v14, %v107_v23 }
  0xa0   :  { %v114_v27 = vmax.f32 %v108_v24, 0.0 }
  0xa5   :  { %v109_v25 = vpop.f32.mrf.mxu0 }
  0xa6   :  { %v110_v26 = vadd.f32 %v446_v14, %v109_v25 }
  0xa8   :  { %v115_v28 = vmax.f32 %v110_v26, 0.0 }
  0xaa   :  { %v117_v29 = vpack.c.bf16 %v115_v28, %v114_v27 }
  0xac   :  { %199 = vmatmul.bf16.vlgmr.msra.gmra.mxu3 %v117_v29 }
 0x119   :  { %v195_v34 = vpop.f32.mrf.mxu1 }
 0x11a   :  { %v196_v36 = vadd.f32 %v447_v35, %v195_v34 }
 0x11c   :  { %v205_v39 = vmax.f32 %v196_v36, 0.0 }
 0x121   :  { %v197_v37 = vpop.f32.mrf.mxu1 }
 0x122   :  { %v198_v38 = vadd.f32 %v447_v35, %v197_v37 }
 0x124   :  { %v206_v40 = vmax.f32 %v198_v38, 0.0 }
 0x126   :  { %v209_v41 = vpack.c.bf16 %v206_v40, %v205_v39 }
 0x128   :  { %287 = vmatmul.bf16.vlgmr.msrb.gmra.mxu0 %v209_v41 }
 0x12f   :  { %v200_v42 = vpop.f32.mrf.mxu3 }
 0x130   :  { %v201_v43 = vadd.f32 %v447_v35, %v200_v42 }
 0x132   :  { %v207_v46 = vmax.f32 %v201_v43, 0.0 }
 0x137   :  { %v202_v44 = vpop.f32.mrf.mxu3 }
 0x138   :  { %v203_v45 = vadd.f32 %v447_v35, %v202_v44 }
 0x13a   :  { %v208_v47 = vmax.f32 %v203_v45, 0.0 }
 0x13c   :  { %v210_v48 = vpack.c.bf16 %v208_v47, %v207_v46 }
 0x13e   :  { %292 = vmatmul.bf16.vlgmr.msra.gmra.mxu2 %v210_v48 }
 0x1a5   :  { %v288_v50 = vpop.f32.mrf.mxu0 }
 0x1a6   :  { %v289_v51 = vadd.f32 %v448_v49, %v288_v50 }
 0x1a8   :  { %449 = vtanh.f32 %v289_v51 }
 0x1ad   :  { %v290_v52 = vpop.f32.mrf.mxu0 }
 0x1ae   :  { %v450_v53 = vpop.eup %449  ;;  %v291_v54 = vadd.f32 %v448_v49, %v290_v52 }
 0x1af   :  { %302 = vst [vmem:[#allocation7] sm:$0xff] %v450_v53 }
 0x1b0   :  { %451 = vtanh.f32 %v291_v54 }
 0x1b6   :  { %v452_v55 = vpop.eup %451 }
 0x1b7   :  { %303 = vst [vmem:[#allocation7 + $0x8] sm:$0xff] %v452_v55 }
 0x1c1   :  { %v293_v56 = vpop.f32.mrf.mxu2 }
 0x1c2   :  { %v294_v57 = vadd.f32 %v448_v49, %v293_v56 }
 0x1c4   :  { %453 = vtanh.f32 %v294_v57 }
 0x1c9   :  { %v295_v58 = vpop.f32.mrf.mxu2 }
 0x1ca   :  { %v454_v59 = vpop.eup %453  ;;  %v296_v60 = vadd.f32 %v448_v49, %v295_v58 }
 0x1cb   :  { %304 = vst [vmem:[#allocation7 + $0x10] sm:$0xff] %v454_v59 }
 0x1cc   :  { %455 = vtanh.f32 %v296_v60 }
 0x1d2   :  { %v456_v61 = vpop.eup %455 }
 0x1d3   :  { %305 = vst [vmem:[#allocation7 + $0x18] sm:$0xff] %v456_v61 }
 0x1d4   :  { %318 = dma.vmem_to_hbm [thread:$0]  %s311_s6, 512, %s313_s22, [#allocation4], %s540_s23, %s540_s23, %s541_s24  }
 0x1d5   :  { %533 = dma.done.wait [#allocation4], 512  }
 0x1d6   :  { %534 = vsyncadd [#allocation4], 4294966784 }
 0x1d7   :  { %323 = vsyncpa [#allocation3], 1 }
 0x1d8   :  { %324 = vsyncpa [#allocation6], 1 }
 0x1d9   :  { %325 = vsyncpa [#allocation4], 1 }

</bundles_post_ra>
